<compile_context>
chip_gen: v5e
topology: v5e:2x2
jax: 0.10.0
libtpu: 0.0.40
codegen_flags: <defaults>
</compile_context>

<pallas_src>
import jax
import jax.numpy as jnp
from jax.experimental import pallas as pl
from jax.experimental.pallas import tpu as pltpu

_TARGET_BLOCK_BYTES = 4 * 1024 * 1024   # ~4 MiB per block (in+out, 2 bufs each -> 16 MiB VMEM)
_VMEM_LIMIT_BYTES = 32 * 1024 * 1024    # explicit scoped-VMEM cap, valid on v5e/v6e/v7x


def _copy_kernel(x_ref, o_ref):
    # Straight copy (identity).  No `* 1.0`: avoids a VALU op and preserves the
    # exact bits (NaN / -0.0 / denormals) just like the float multiply would.
    o_ref[...] = x_ref[...]


def _dma_copy_kernel(x_hbm, o_hbm, sem):
    # Whole-array HBM -> HBM DMA: no VMEM round trip, works for any shape/size.
    cp = pltpu.make_async_copy(x_hbm, o_hbm, sem)
    cp.start()
    cp.wait()


def _sublane_multiple(dtype) -> int:
    # Packed min sublane tile: 8 for 32-bit, 16 for 16-bit, 32 for 8-bit dtypes.
    itemsize = jnp.dtype(dtype).itemsize
    return 8 * max(1, 4 // itemsize)


def _identity_dma(x: jax.Array) -> jax.Array:
    """Identity copy via one direct HBM->HBM DMA (any shape, any alignment)."""
    n = x.size
    itemsize = jnp.dtype(x.dtype).itemsize
    return pl.pallas_call(
        _dma_copy_kernel,
        out_shape=jax.ShapeDtypeStruct(x.shape, x.dtype),
        in_specs=[pl.BlockSpec(memory_space=pl.ANY)],
        out_specs=pl.BlockSpec(memory_space=pl.ANY),
        scratch_shapes=[pltpu.SemaphoreType.DMA],
        cost_estimate=pl.CostEstimate(
            flops=0, transcendentals=0, bytes_accessed=2 * n * itemsize),
    )(x)


def _identity_pipelined(x2d: jax.Array) -> jax.Array:
    """Identity copy via a lane-dense, double-buffered BlockSpec pipeline."""
    rows, lane = x2d.shape
    dtype = x2d.dtype
    itemsize = jnp.dtype(dtype).itemsize
    min_tile = _sublane_multiple(dtype)

    # Row-tile size: aim for ~4 MiB per block, rounded to the packed sublane tile.
    tm = max(1, _TARGET_BLOCK_BYTES // (lane * itemsize))
    tm = max(min_tile, (tm // min_tile) * min_tile)
    if tm >= rows:
        tm = rows  # block == full dims is always legal
        # If the rows split cleanly, give the grid >= 2 steps so v7x megacore
        # can stream with both TensorCores.
        if rows % (2 * min_tile) == 0:
            tm = rows // 2
    grid = (pl.cdiv(rows, tm),)

    return pl.pallas_call(
        _copy_kernel,
        out_shape=jax.ShapeDtypeStruct((rows, lane), dtype),
        grid_spec=pl.GridSpec(
            grid=grid,
            in_specs=[pl.BlockSpec((tm, lane), lambda i: (i, 0))],
            out_specs=pl.BlockSpec((tm, lane), lambda i: (i, 0)),
        ),
        compiler_params=pltpu.CompilerParams(
            dimension_semantics=("parallel",),
            vmem_limit_bytes=_VMEM_LIMIT_BYTES,
        ),
        cost_estimate=pl.CostEstimate(
            flops=0, transcendentals=0,
            bytes_accessed=2 * rows * lane * itemsize),
    )(x2d)


def identical_map(x: jax.Array, *, use_pallas: bool = True) -> jax.Array:
    """Pallas equivalent of PyTorch identical_map.forward (x * 1.0 == identity).

    For float dtypes `x * 1.0` is a bit-exact identity, so `use_pallas=False`
    returns x directly (zero HBM traffic).  The Pallas path is kept because the
    exercise requires expressing the forward pass as a kernel.
    """
    # TODO(synk): PyTorch's `x * 1.0` promotes integer tensors to float; this
    # implementation preserves the input dtype (exact identity, float semantics).
    if x.size == 0 or not use_pallas:
        return x

    n = x.size
    # Widest lane-dense last dim that evenly divides the element count:
    # longer unmasked vst bursts and fewer grid steps.
    lane = next((c for c in (2048, 1024, 512, 256, 128) if n % c == 0), None)
    if lane is None:
        # Not a multiple of 128: single whole-array HBM->HBM DMA copy
        # (no pad, no trailing slice, exactly 2*n bytes of HBM traffic).
        return _identity_dma(x)

    rows = n // lane
    out2d = _identity_pipelined(x.reshape(rows, lane))
    return out2d.reshape(x.shape)


if __name__ == "__main__":
    key = jax.random.PRNGKey(0)

    # Primary: NCHW float input (batch=2, channels=4, spatial=16x16) -> pipelined copy path.
    x = jax.random.normal(key, (2, 4, 16, 16), dtype=jnp.float32)
    y = jax.block_until_ready(identical_map(x))
    assert y.shape == x.shape and y.dtype == x.dtype
    assert bool(jnp.all(y == x))

    # Secondary: element count not a multiple of 128 -> whole-array HBM->HBM DMA path.
    x2 = jnp.arange(3 * 5 * 7, dtype=jnp.float32).reshape(3, 5, 7)
    y2 = jax.block_until_ready(identical_map(x2))
    assert y2.shape == x2.shape and y2.dtype == x2.dtype
    assert bool(jnp.all(y2 == x2))

    print("KERNEL_OK")
</pallas_src>

<mosaic_0001>
module attributes {stable_mosaic.version = 11 : i64} {
  func.func @_copy_kernel(%arg0: i32, %arg1: memref<1x2048xf32, #tpu.memory_space<vmem>>, %arg2: memref<1x2048xf32, #tpu.memory_space<vmem>>) attributes {dimension_semantics = [#tpu.dimension_semantics<parallel>], iteration_bounds = array<i64: 1>, scalar_prefetch = 0 : i64, scratch_operands = 0 : i64, tpu.core_type = #tpu.core_type<tc>, window_params = [{transform_indices = @transform_0, window_bounds = array<i64: 1, 2048>}, {transform_indices = @transform_1, window_bounds = array<i64: 1, 2048>}]} {
    %c0 = arith.constant 0 : index
    %c0_0 = arith.constant 0 : index
    %0 = vector.load %arg1[%c0, %c0_0] : memref<1x2048xf32, #tpu.memory_space<vmem>>, vector<1x2048xf32>
    %c0_1 = arith.constant 0 : index
    %c0_2 = arith.constant 0 : index
    %1 = vector.load %arg2[%c0_1, %c0_2] : memref<1x2048xf32, #tpu.memory_space<vmem>>, vector<1x2048xf32>
    tpu.vector_store %arg2[%c0_1, %c0_2], %0 {strides = array<i32>} : memref<1x2048xf32, #tpu.memory_space<vmem>>, vector<1x2048xf32>,
    return
  }
  func.func @transform_0(%arg0: i32) -> (i32, i32) {
    %c0_i32 = arith.constant 0 : i32
    %c0_i32_0 = arith.constant 0 : i32
    return %arg0, %c0_i32 : i32, i32
  }
  func.func @transform_1(%arg0: i32) -> (i32, i32) {
    %c0_i32 = arith.constant 0 : i32
    %c0_i32_0 = arith.constant 0 : i32
    return %arg0, %c0_i32 : i32, i32
  }
}

</mosaic_0001>

<bundles_post_ra>
// kernel: tpu_custom_call.1
= control target key start
LH: loop header
LB: loop body
LE: loop exit
PB: predicated region body
PF: predicated region fallthrough
CT: control target
= control target key end

     0   :  { %6 = vsyncpa [#allocation3], 0  ;;  %s116_s0 = inlined_call_operand.hbm [shape: f32[1,2048], index: 0, kind: input, shape index: {}]   ;;  %s117_s1 = inlined_call_operand.hbm [shape: f32[1,2048], index: 1, kind: output, shape index: {}]  }
   0x1   :  { %7 = vsyncpa [#allocation4], 0  ;;  %s13_s8 = sshll.u32 %s116_s0, 4  ;;  %s98_s9 = smov [#allocation2]   ;;  %s14_s8 = int_to_ptr.hbm [resolvable:$true] %s13_s8 }
   0x2   :  { %s15_s10 = sshll.u32 %s98_s9, 4  ;;  %s16_s10 = int_to_ptr.vmem [resolvable:$true] %s15_s10 }
   0x3   :  { %18 = dma.hbm_to_vmem [thread:$0]  %s14_s8, 256, %s16_s10, [#allocation3]  }
   0x4   :  { %94 = dma.done.wait [#allocation3], 256  }
   0x5   :  { %95 = vsyncadd [#allocation3], 4294967040  ;;  %s99_s11 = smov [#allocation5]   ;;  %s34_s15 = sshll.u32 %s117_s1, 4  ;;  %v23_v0 = vld [vmem:[#allocation2] sm:$0xff]  ;;  %v24_v1 = vld [vmem:[#allocation2 + $0x8] sm:$0xff]  ;;  %s35_s15 = int_to_ptr.hbm [resolvable:$true] %s34_s15 }
   0x6   :  { %s32_s12 = sshll.u32 %s99_s11, 4  ;;  %25 = vst [vmem:[#allocation5] sm:$0xff] %v23_v0  ;;  %s33_s12 = int_to_ptr.vmem [resolvable:$true] %s32_s12 }
   0x7   :  { %26 = vst [vmem:[#allocation5 + $0x8] sm:$0xff] %v24_v1 }
   0x8   :  { %37 = dma.vmem_to_hbm [thread:$0]  %s33_s12, 256, %s35_s15, [#allocation4]  }
   0x9   :  { %96 = dma.done.wait [#allocation4], 256  }
   0xa   :  { %97 = vsyncadd [#allocation4], 4294967040 }
   0xb   :  { %42 = vsyncpa [#allocation3], 1 }
   0xc   :  { %43 = vsyncpa [#allocation4], 1 }

</bundles_post_ra>
